<compile_context>
chip_gen: v6e
topology: v6e:2x2x1
jax: 0.10.0
libtpu: 0.0.40
codegen_flags: <defaults>
</compile_context>

<pallas_src>
import math

import jax
import jax.numpy as jnp
from jax.experimental import pallas as pl
from jax.experimental.pallas import tpu as pltpu


def _layer_scale_kernel(x_ref, g_ref, o_ref):
    # (TR, TD) * (1, TD) -> (TR, TD): single VPU broadcast multiply.
    # Promotion happens automatically (e.g. bf16 x * f32 gamma -> f32), cast on store.
    o_ref[...] = (x_ref[...] * g_ref[...]).astype(o_ref.dtype)


def _largest_lane_tile(d_eff, max_cols):
    """Largest multiple-of-128 divisor of d_eff that is <= max_cols (falls back to 128)."""
    n = d_eff // 128
    best = 128
    d = 1
    while d * d <= n:
        if n % d == 0:
            for cand in (d, n // d):
                td = cand * 128
                if best < td <= max_cols:
                    best = td
        d += 1
    return best


def layer_scale(x, gamma, *, target_block_bytes=8 << 20,
                vmem_limit_bytes=48 << 20, inplace=False):
    """x: (..., D); gamma: (D,). Returns x * gamma (broadcast over leading dims)."""
    orig_shape = x.shape
    D = orig_shape[-1]
    assert gamma.shape == (D,), f"gamma shape {gamma.shape} != ({D},)"

    out_dtype = jnp.result_type(x.dtype, gamma.dtype)

    R = 1
    for s in orig_shape[:-1]:
        R *= s

    x2 = x.reshape(R, D)
    g2 = gamma.reshape(1, D)                       # keep parameter dtype (usually fp32)

    # --- Lane-dense folding: make the last dim a multiple of 128 when possible.
    k = 128 // math.gcd(D, 128)
    if k > 1 and R % k == 0:
        R_eff, D_eff = R // k, k * D
        x2 = x2.reshape(R_eff, D_eff)              # contiguous row-major fold
        g2 = jnp.tile(g2, (1, k))                  # (1, k*D), one gamma per folded row
    else:
        R_eff, D_eff = R, D
    # TODO(synk): a non-128-multiple D that is both huge and not foldable
    # (R % k != 0) still uses full-width blocks; would need padded lane tiling.

    in_bytes = x2.dtype.itemsize
    out_bytes = jnp.dtype(out_dtype).itemsize
    item_bytes = max(in_bytes, out_bytes)
    # Sublane alignment matched to the input dtype's packing: 8 (f32), 16 (bf16), 32 (int8/fp8).
    row_align = 8 * max(1, 4 // max(1, in_bytes))

    # --- Lane tiling only for very wide rows (keeps blocks VMEM-safe on v7x).
    TD = D_eff
    if D_eff % 128 == 0 and D_eff * item_bytes * row_align > target_block_bytes:
        max_cols = max(128, target_block_bytes // (row_align * item_bytes))
        TD = _largest_lane_tile(D_eff, max_cols)

    # --- Row tiling: ~target_block_bytes per block, sublane-packing aligned.
    bytes_per_block_row = TD * item_bytes
    rows_for_target = max(1, target_block_bytes // bytes_per_block_row)
    if rows_for_target >= R_eff:
        TR = R_eff                                  # whole extent fits in one block
        total_bytes = R_eff * D_eff * item_bytes
        if total_bytes >= (1 << 20) and R_eff >= 4 * row_align:
            # Non-tiny input: split into >=2 row blocks so both v7x TCs stream.
            half = -(-R_eff // 2)
            tr = ((half + row_align - 1) // row_align) * row_align
            if tr < R_eff:
                TR = tr
    else:
        TR = max(row_align, (rows_for_target // row_align) * row_align)

    grid = (pl.cdiv(R_eff, TR), pl.cdiv(D_eff, TD))

    kwargs = {}
    if inplace and out_dtype == x2.dtype:
        # In-place variant (PyTorch x.mul_(gamma)): reuse x's HBM buffer for the output.
        kwargs["input_output_aliases"] = {0: 0}

    out = pl.pallas_call(
        _layer_scale_kernel,
        out_shape=jax.ShapeDtypeStruct((R_eff, D_eff), out_dtype),
        grid_spec=pltpu.PrefetchScalarGridSpec(
            num_scalar_prefetch=0,
            grid=grid,
            in_specs=[
                pl.BlockSpec((TR, TD), lambda i, j: (i, j)),   # x row/lane slab
                pl.BlockSpec((1, TD), lambda i, j: (0, j)),    # gamma (resident per lane tile)
            ],
            out_specs=pl.BlockSpec((TR, TD), lambda i, j: (i, j)),
        ),
        compiler_params=pltpu.CompilerParams(
            dimension_semantics=("parallel", "parallel"),      # fully independent blocks
            vmem_limit_bytes=vmem_limit_bytes,
        ),
        **kwargs,
    )(x2, g2)

    return out.reshape(orig_shape)


def reference(x, gamma):
    """Pure-JAX mirror of LayerScale.forward (inplace=False path)."""
    return x * gamma


if __name__ == "__main__":
    key = jax.random.PRNGKey(0)
    kx, kg = jax.random.split(key, 2)

    # Shapes implied by a transformer-block LayerScale: (batch, seq, dim).
    B, S, dim = 2, 8, 32
    x = jax.random.normal(kx, (B, S, dim), dtype=jnp.float32)

    # Module init is gamma = init_values * ones(dim); perturb it so the
    # broadcast is actually exercised (deterministic from PRNGKey(0)).
    init_values = 1e-5
    gamma = init_values * jnp.ones((dim,), jnp.float32) \
        + 0.1 * jax.random.normal(kg, (dim,), dtype=jnp.float32)

    out = layer_scale(x, gamma)
    out = jax.block_until_ready(out)

    ref = reference(x, gamma)
    assert out.shape == x.shape
    assert out.dtype == ref.dtype
    assert jnp.allclose(out, ref, atol=1e-6, rtol=1e-6)

    # NOTE: the largest absolute win for this op is fusing it into the adjacent
    # residual/projection kernel (removes a full HBM round trip of x); as a
    # standalone kernel it is purely HBM-bandwidth-bound.
    print("KERNEL_OK")
</pallas_src>

<mosaic_0001>
module attributes {stable_mosaic.version = 11 : i64} {
  func.func @_layer_scale_kernel(%arg0: i32, %arg1: i32, %arg2: memref<4x128xf32, #tpu.memory_space<vmem>>, %arg3: memref<1x128xf32, #tpu.memory_space<vmem>>, %arg4: memref<4x128xf32, #tpu.memory_space<vmem>>) attributes {dimension_semantics = [#tpu.dimension_semantics<parallel>, #tpu.dimension_semantics<parallel>], iteration_bounds = array<i64: 1, 1>, scalar_prefetch = 0 : i64, scratch_operands = 0 : i64, tpu.core_type = #tpu.core_type<tc>, window_params = [{transform_indices = @transform_0, window_bounds = array<i64: 4, 128>}, {transform_indices = @transform_1, window_bounds = array<i64: 1, 128>}, {transform_indices = @transform_2, window_bounds = array<i64: 4, 128>}]} {
    %c0 = arith.constant 0 : index
    %c0_0 = arith.constant 0 : index
    %0 = vector.load %arg2[%c0, %c0_0] : memref<4x128xf32, #tpu.memory_space<vmem>>, vector<4x128xf32>
    %c0_1 = arith.constant 0 : index
    %c0_2 = arith.constant 0 : index
    %1 = vector.load %arg3[%c0_1, %c0_2] : memref<1x128xf32, #tpu.memory_space<vmem>>, vector<1x128xf32>
    %2 = vector.broadcast %1 : vector<1x128xf32> to vector<4x128xf32>
    %3 = arith.mulf %0, %2 : vector<4x128xf32>
    %c0_3 = arith.constant 0 : index
    %c0_4 = arith.constant 0 : index
    %4 = vector.load %arg4[%c0_3, %c0_4] : memref<4x128xf32, #tpu.memory_space<vmem>>, vector<4x128xf32>
    tpu.vector_store %arg4[%c0_3, %c0_4], %3 {strides = array<i32>} : memref<4x128xf32, #tpu.memory_space<vmem>>, vector<4x128xf32>,
    return
  }
  func.func @transform_0(%arg0: i32, %arg1: i32) -> (i32, i32) {
    %c0_i32 = arith.constant 0 : i32
    return %arg0, %arg1 : i32, i32
  }
  func.func @transform_1(%arg0: i32, %arg1: i32) -> (i32, i32) {
    %c0_i32 = arith.constant 0 : i32
    %c0_i32_0 = arith.constant 0 : i32
    return %c0_i32, %arg1 : i32, i32
  }
  func.func @transform_2(%arg0: i32, %arg1: i32) -> (i32, i32) {
    %c0_i32 = arith.constant 0 : i32
    return %arg0, %arg1 : i32, i32
  }
}

</mosaic_0001>

<bundles_post_ra>
// kernel: tpu_custom_call.1
= control target key start
LH: loop header
LB: loop body
LE: loop exit
PB: predicated region body
PF: predicated region fallthrough
CT: control target
= control target key end

     0   :  { %7 = vsyncpa [#allocation3], 0  ;;  %s122_s0 = inlined_call_operand.hbm [shape: f32[4,128], index: 0, kind: input, shape index: {}]   ;;  %s123_s1 = inlined_call_operand.vmem [shape: f32[1,128], index: 1, kind: input, shape index: {}]   ;;  %s124_s2 = inlined_call_operand.hbm [shape: f32[4,128], index: 2, kind: output, shape index: {}]  }
   0x1   :  { %8 = vsyncpa [#allocation4], 0  ;;  %s96_s9 = smov [#allocation2]  }
   0x2   :  { %s15_s10 = sshll.u32 %s96_s9, 4  ;;  %s16_s10 = int_to_ptr.vmem [resolvable:$true] %s15_s10 }
   0x3   :  { %s60_s11 = scalar_lea.vmem %s16_s10, 64  ;;  %p65_p1 = scmp.lt.s32.totalorder %s16_s10, %s16_s10 }
   0x4   :  { %p61_p0 = scmp.ne.s32.totalorder %s16_s10, %s60_s11  ;;  %p66_p2 = scmp.lt.s32.totalorder %s60_s11, %s60_s11 }
   0x6   :  { %p67_p3 = por %p66_p2, %p65_p1 }
   0x8   :  { %p68_p4 = pnand %p67_p3, %p61_p0 }
   0xa   :  { %71 = shalt.err (!%p68_p4)
}
   0xb   :  { %18 = dma.hbm_to_vmem [thread:$0]  %s122_s0, 64, %s16_s10, [#allocation3]  }
   0xc   :  { %92 = dma.done.wait [#allocation3], 64  }
   0xd   :  { %93 = vsyncadd [#allocation3], 4294967232  ;;  %s97_s14 = smov [#allocation5]   ;;  %v24_v0 = vld [vmem:[#allocation2] sm:$0xf] }
   0xe   :  { %s40_s15 = sshll.u32 %s97_s14, 4  ;;  %v49_v1 = vld [vmem:[%s123_s1] ss:$0 sm:$0xff]  ;;  %s41_s15 = int_to_ptr.vmem [resolvable:$true] %s40_s15 }
   0xf   :  { %v32_v2 = vmul.f32 %v49_v1, %v24_v0  ;;  %s72_s18 = scalar_lea.vmem %s41_s15, 64  ;;  %p77_p6 = scmp.lt.s32.totalorder %s41_s15, %s41_s15 }
  0x10   :  { %p73_p5 = scmp.ne.s32.totalorder %s41_s15, %s72_s18  ;;  %p78_p7 = scmp.lt.s32.totalorder %s72_s18, %s72_s18 }
  0x11   :  { %33 = vst [vmem:[#allocation5] sm:$0xf] %v32_v2 }
  0x12   :  { %p79_p8 = por %p78_p7, %p77_p6 }
  0x14   :  { %p80_p9 = pnand %p79_p8, %p73_p5 }
  0x16   :  { %83 = shalt.err (!%p80_p9)
}
  0x17   :  { %43 = dma.vmem_to_hbm [thread:$0]  %s41_s15, 64, %s124_s2, [#allocation4]  }
  0x18   :  { %94 = dma.done.wait [#allocation4], 64  }
  0x19   :  { %95 = vsyncadd [#allocation4], 4294967232 }
  0x1a   :  { %47 = vsyncpa [#allocation3], 1 }
  0x1b   :  { %48 = vsyncpa [#allocation4], 1 }

</bundles_post_ra>
